<compile_context>
chip_gen: v6e
topology: v6e:2x2x1
jax: 0.10.0
libtpu: 0.0.40
codegen_flags: <defaults>
</compile_context>

<pallas_src>
import jax
import jax.numpy as jnp
from jax.experimental import pallas as pl
from jax.experimental.pallas import tpu as pltpu

EPS = 1e-5


def _stats_kernel(p_ref, g_ref, s_ref):
    """Pass 1: accumulate patch Gram matrix and patch row-sums.

    p_ref: (1, K_pad, TM)    bf16 im2col patches (lane-dense)
    g_ref: (1, K_pad, K_pad) f32 resident accumulator, G += P @ P^T
    s_ref: (1, K_pad, 1)     f32 resident accumulator, s += rowsum(P)
    """
    @pl.when((pl.program_id(1) == 0) & (pl.program_id(2) == 0))
    def _():
        g_ref[...] = jnp.zeros_like(g_ref)
        s_ref[...] = jnp.zeros_like(s_ref)

    p = p_ref[0]                                              # (K_pad, TM) bf16
    gram = jax.lax.dot_general(p, p, (((1,), (1,)), ((), ())),
                               preferred_element_type=jnp.float32)  # (K_pad, K_pad)
    g_ref[...] += gram[None, :, :]
    s_ref[...] += jnp.sum(p.astype(jnp.float32), axis=1, keepdims=True)[None, :, :]


def _apply_kernel(p_ref, w_ref, scale_ref, shift_ref, o_ref):
    """Pass 2: conv tile + fused BN affine + tanh; lane-dense (Cout, TM) store."""
    acc = jnp.dot(w_ref[...], p_ref[0],
                  preferred_element_type=jnp.float32)         # (Cout, TM) f32
    y = acc * scale_ref[...] + shift_ref[...]
    o_ref[...] = jnp.tanh(y).astype(o_ref.dtype)[None, :, :]


def stem_forward(x_nchw, w_oihw, gamma, beta, *, stride=2, pad=1,
                 block_m_target=32768, out_dtype=jnp.float32):
    """x_nchw: (N, Cin, H, W); w_oihw: (Cout, Cin, KH, KW). Returns NCHW out_dtype."""
    N, Cin, H, W = x_nchw.shape
    Cout, _, KH, KW = w_oihw.shape
    OH = (H + 2 * pad - KH) // stride + 1
    OW = (W + 2 * pad - KW) // stride + 1
    OHW = OH * OW
    M = N * OHW
    K = Cin * KH * KW
    K_pad = max(8, pl.cdiv(K, 8) * 8)          # 27 -> 32: clean bf16 sublane pack

    # ---- chip-aware VMEM budget / tile size ----
    phys_vmem = 128 * 1024 * 1024
    try:
        phys_vmem = int(getattr(pltpu.get_tpu_info(), "vmem_capacity_bytes", phys_vmem))
    except Exception:
        pass
    vmem_limit = min(phys_vmem // 2, 64 * 1024 * 1024)   # 64MB v5e/v6e, 32MB v7x
    out_itemsize = jnp.dtype(out_dtype).itemsize
    # per-lane VMEM: patch double-buffer + output double-buffer + f32 acc temp
    bytes_per_lane = (2 * 2 * K_pad) + (2 * out_itemsize * Cout) + (4 * Cout)
    block_cap = max(128, ((vmem_limit // 2) // bytes_per_lane) // 128 * 128)

    ohw_aligned = pl.cdiv(OHW, 128) * 128
    block_m = max(128, min(block_cap, (block_m_target // 128) * 128, ohw_aligned))
    num_j = pl.cdiv(ohw_aligned, block_m)
    ohw_pad = num_j * block_m

    # ---- im2col in (N, K, OHW) layout (k = cin*KH*KW + kh*KW + kw) ----
    x_pad = jnp.pad(x_nchw, ((0, 0), (0, 0), (pad, pad), (pad, pad)))
    pieces = []
    for kh in range(KH):
        for kw in range(KW):
            pieces.append(
                x_pad[:, :, kh:kh + stride * OH:stride, kw:kw + stride * OW:stride])
    patches = jnp.stack(pieces, axis=2)                  # (N, Cin, KH*KW, OH, OW)
    patches = patches.reshape(N, K, OHW)
    patches = jnp.pad(
        patches, ((0, 0), (0, K_pad - K), (0, ohw_pad - OHW))).astype(jnp.bfloat16)
    w2d = jnp.pad(w_oihw.reshape(Cout, K),
                  ((0, 0), (0, K_pad - K))).astype(jnp.bfloat16)   # (Cout, K_pad)

    # ---- pass 1: Gram matrix + row sums of the patches (split across cores) ----
    nsplit = 2 if (N >= 2 and N % 2 == 0) else 1
    n_per = N // nsplit
    g_parts, s_parts = pl.pallas_call(
        _stats_kernel,
        out_shape=(jax.ShapeDtypeStruct((nsplit, K_pad, K_pad), jnp.float32),
                   jax.ShapeDtypeStruct((nsplit, K_pad, 1), jnp.float32)),
        grid=(nsplit, n_per, num_j),
        in_specs=[pl.BlockSpec((1, K_pad, block_m),
                               lambda c, n, j, n_per=n_per: (c * n_per + n, 0, j))],
        out_specs=(pl.BlockSpec((1, K_pad, K_pad), lambda c, n, j: (c, 0, 0)),
                   pl.BlockSpec((1, K_pad, 1), lambda c, n, j: (c, 0, 0))),
        compiler_params=pltpu.CompilerParams(
            dimension_semantics=("parallel", "arbitrary", "arbitrary"),
            vmem_limit_bytes=vmem_limit),
    )(patches)

    # ---- finalize BN (tiny (Cout,) / (K_pad,K_pad) math, biased var like PyTorch) ----
    G = jnp.sum(g_parts, axis=0)                          # (K_pad, K_pad)
    s = jnp.sum(s_parts, axis=0)                          # (K_pad, 1)
    wf = w2d.astype(jnp.float32)                          # bf16-rounded weights, f32
    cnt = jnp.float32(M)
    csum = wf @ s                                         # (Cout, 1)
    cssq = jnp.sum((wf @ G) * wf, axis=1, keepdims=True)  # (Cout, 1)
    mean = csum / cnt
    var = jnp.maximum(cssq / cnt - mean * mean, 0.0)
    scale = gamma.reshape(Cout, 1).astype(jnp.float32) * jax.lax.rsqrt(var + EPS)
    shift = beta.reshape(Cout, 1).astype(jnp.float32) - mean * scale

    # ---- pass 2: conv + BN affine + tanh, output directly in (N, Cout, OH*OW) ----
    out = pl.pallas_call(
        _apply_kernel,
        out_shape=jax.ShapeDtypeStruct((N, Cout, ohw_pad), out_dtype),
        grid=(N, num_j),
        in_specs=[pl.BlockSpec((1, K_pad, block_m), lambda n, j: (n, 0, j)),
                  pl.BlockSpec((Cout, K_pad), lambda n, j: (0, 0)),
                  pl.BlockSpec((Cout, 1), lambda n, j: (0, 0)),
                  pl.BlockSpec((Cout, 1), lambda n, j: (0, 0))],
        out_specs=pl.BlockSpec((1, Cout, block_m), lambda n, j: (n, 0, j)),
        compiler_params=pltpu.CompilerParams(
            dimension_semantics=("parallel", "parallel"),
            vmem_limit_bytes=vmem_limit),
    )(patches, w2d, scale, shift)

    # Free reshape to NCHW (no transpose). Slice is a no-op when OHW % 128 == 0.
    return out[:, :, :OHW].reshape(N, Cout, OH, OW)


def stem_reference(x, w, gamma, beta, *, stride=2, pad=1, matmul_dtype=jnp.float32):
    """Pure-JAX reference (conv + training-mode BN + tanh)."""
    y = jax.lax.conv_general_dilated(
        x.astype(matmul_dtype), w.astype(matmul_dtype),
        window_strides=(stride, stride),
        padding=((pad, pad), (pad, pad)),
        dimension_numbers=("NCHW", "OIHW", "NCHW"),
        preferred_element_type=jnp.float32,
    )
    mu = jnp.mean(y, axis=(0, 2, 3), keepdims=True)
    var = jnp.mean((y - mu) ** 2, axis=(0, 2, 3), keepdims=True)
    yn = (y - mu) * jax.lax.rsqrt(var + EPS)
    yn = yn * gamma.reshape(1, -1, 1, 1) + beta.reshape(1, -1, 1, 1)
    return jnp.tanh(yn)


if __name__ == "__main__":
    key = jax.random.PRNGKey(0)
    kx, kw, kg, kb = jax.random.split(key, 4)

    # Stem(out_channels=64, in_channels=3, kernel_size=3), stride 2, pad 1.
    N, Cin, H, W = 2, 3, 32, 32
    Cout, KH, KW = 64, 3, 3

    x = jax.random.normal(kx, (N, Cin, H, W), dtype=jnp.float32)
    w = jax.random.normal(kw, (Cout, Cin, KH, KW), dtype=jnp.float32) * 0.1
    gamma = jax.random.uniform(kg, (Cout,), dtype=jnp.float32, minval=0.5, maxval=1.5)
    beta = jax.random.normal(kb, (Cout,), dtype=jnp.float32) * 0.1

    ref_bf16 = stem_reference(x, w, gamma, beta, matmul_dtype=jnp.bfloat16)
    ref_f32 = stem_reference(x, w, gamma, beta, matmul_dtype=jnp.float32)

    # Small tile (block_m_target=128 with OH*OW = 256 -> 2 m-tiles per image,
    # plus the 2-way core split on N): exercises the cross-tile / cross-core
    # Gram accumulation path.
    out = stem_forward(x, w, gamma, beta, block_m_target=128)
    out = jax.block_until_ready(out)
    assert out.shape == (N, Cout, H // 2, W // 2), out.shape

    err_bf16 = float(jnp.max(jnp.abs(out - ref_bf16)))
    assert jnp.allclose(out, ref_bf16, atol=2e-3, rtol=2e-3), err_bf16
    err_f32 = float(jnp.max(jnp.abs(out - ref_f32)))
    assert jnp.allclose(out, ref_f32, atol=5e-2, rtol=5e-2), err_f32

    # Default (auto, large) tile config must agree with the small-tile run.
    out_auto = jax.block_until_ready(stem_forward(x, w, gamma, beta))
    err_auto = float(jnp.max(jnp.abs(out_auto - out)))
    assert jnp.allclose(out_auto, out, atol=1e-5, rtol=1e-5), err_auto

    # bf16-output path (halves pass-2 HBM write traffic): loose sanity check.
    out_bf16 = jax.block_until_ready(
        stem_forward(x, w, gamma, beta, out_dtype=jnp.bfloat16))
    assert out_bf16.dtype == jnp.bfloat16
    err_b = float(jnp.max(jnp.abs(out_bf16.astype(jnp.float32) - ref_f32)))
    assert jnp.allclose(out_bf16.astype(jnp.float32), ref_f32,
                        atol=5e-2, rtol=5e-2), err_b

    print("KERNEL_OK")
</pallas_src>

<mosaic_0001>
module attributes {stable_mosaic.version = 11 : i64} {
  func.func @_stats_kernel(%arg0: i32, %arg1: i32, %arg2: i32, %arg3: memref<1x32x128xbf16, #tpu.memory_space<vmem>>, %arg4: memref<1x32x32xf32, #tpu.memory_space<vmem>>, %arg5: memref<1x32x1xf32, #tpu.memory_space<vmem>>) attributes {dimension_semantics = [#tpu.dimension_semantics<parallel>, #tpu.dimension_semantics<arbitrary>, #tpu.dimension_semantics<arbitrary>], iteration_bounds = array<i64: 2, 1, 2>, scalar_prefetch = 0 : i64, scratch_operands = 0 : i64, tpu.core_type = #tpu.core_type<tc>, window_params = [{transform_indices = @transform_0, window_bounds = array<i64: 1, 32, 128>}, {transform_indices = @transform_1, window_bounds = array<i64: 1, 32, 32>}, {transform_indices = @transform_2, window_bounds = array<i64: 1, 32, 1>}]} {
    %c0_i32 = arith.constant 0 : i32
    %0 = arith.cmpi eq, %arg1, %c0_i32 : i32
    %c0_i32_0 = arith.constant 0 : i32
    %1 = arith.cmpi eq, %arg2, %c0_i32_0 : i32
    %2 = arith.andi %0, %1 : i1
    %3 = arith.extui %2 : i1 to i32
    %c0_i32_1 = arith.constant 0 : i32
    %4 = arith.cmpi ne, %3, %c0_i32_1 : i32
    scf.if %4 {
      %cst_17 = arith.constant 0.000000e+00 : f32
      %19 = vector.broadcast %cst_17 : f32 to vector<1x32x32xf32>
      %c0_18 = arith.constant 0 : index
      %c0_19 = arith.constant 0 : index
      %c0_20 = arith.constant 0 : index
      %20 = vector.load %arg4[%c0_18, %c0_19, %c0_20] : memref<1x32x32xf32, #tpu.memory_space<vmem>>, vector<1x32x32xf32>
      tpu.vector_store %arg4[%c0_18, %c0_19, %c0_20], %19 {strides = array<i32>} : memref<1x32x32xf32, #tpu.memory_space<vmem>>, vector<1x32x32xf32>,
      %cst_21 = arith.constant 0.000000e+00 : f32
      %21 = vector.broadcast %cst_21 : f32 to vector<1x32x1xf32>
      %c0_22 = arith.constant 0 : index
      %c0_23 = arith.constant 0 : index
      %c0_24 = arith.constant 0 : index
      %22 = vector.load %arg5[%c0_22, %c0_23, %c0_24] : memref<1x32x1xf32, #tpu.memory_space<vmem>>, vector<1x32x1xf32>
      tpu.vector_store %arg5[%c0_22, %c0_23, %c0_24], %21 {strides = array<i32>} : memref<1x32x1xf32, #tpu.memory_space<vmem>>, vector<1x32x1xf32>,
    } else {
    }
    %c0 = arith.constant 0 : index
    %c0_2 = arith.constant 0 : index
    %c0_3 = arith.constant 0 : index
    %5 = vector.load %arg3[%c0, %c0_2, %c0_3] : memref<1x32x128xbf16, #tpu.memory_space<vmem>>, vector<1x32x128xbf16>
    %6 = vector.shape_cast %5 : vector<1x32x128xbf16> to vector<32x128xbf16>
    %cst = arith.constant dense<0.000000e+00> : vector<32x32xf32>
    %7 = tpu.matmul %6, %6, %cst {dimension_numbers = #tpu.dot_dimension_numbers<[1], [1], [0], [0], [0, 0, 1, 0], [], []>} : vector<32x128xbf16>, vector<32x128xbf16>, vector<32x32xf32> -> vector<32x32xf32>
    %c0_4 = arith.constant 0 : index
    %c0_5 = arith.constant 0 : index
    %c0_6 = arith.constant 0 : index
    %8 = vector.load %arg4[%c0_4, %c0_5, %c0_6] : memref<1x32x32xf32, #tpu.memory_space<vmem>>, vector<1x32x32xf32>
    %9 = vector.shape_cast %7 : vector<32x32xf32> to vector<1x32x32xf32>
    %10 = arith.addf %8, %9 : vector<1x32x32xf32>
    %c0_7 = arith.constant 0 : index
    %c0_8 = arith.constant 0 : index
    %c0_9 = arith.constant 0 : index
    %11 = vector.load %arg4[%c0_7, %c0_8, %c0_9] : memref<1x32x32xf32, #tpu.memory_space<vmem>>, vector<1x32x32xf32>
    tpu.vector_store %arg4[%c0_7, %c0_8, %c0_9], %10 {strides = array<i32>} : memref<1x32x32xf32, #tpu.memory_space<vmem>>, vector<1x32x32xf32>,
    %c0_10 = arith.constant 0 : index
    %c0_11 = arith.constant 0 : index
    %c0_12 = arith.constant 0 : index
    %12 = vector.load %arg5[%c0_10, %c0_11, %c0_12] : memref<1x32x1xf32, #tpu.memory_space<vmem>>, vector<1x32x1xf32>
    %13 = arith.extf %6 : vector<32x128xbf16> to vector<32x128xf32>
    %cst_13 = arith.constant dense<0.000000e+00> : vector<32xf32>
    %14 = vector.multi_reduction <add>, %13, %cst_13 [1] : vector<32x128xf32> to vector<32xf32>
    %15 = vector.shape_cast %14 : vector<32xf32> to vector<32x1xf32>
    %16 = vector.shape_cast %15 : vector<32x1xf32> to vector<1x32x1xf32>
    %17 = arith.addf %12, %16 : vector<1x32x1xf32>
    %c0_14 = arith.constant 0 : index
    %c0_15 = arith.constant 0 : index
    %c0_16 = arith.constant 0 : index
    %18 = vector.load %arg5[%c0_14, %c0_15, %c0_16] : memref<1x32x1xf32, #tpu.memory_space<vmem>>, vector<1x32x1xf32>
    tpu.vector_store %arg5[%c0_14, %c0_15, %c0_16], %17 {strides = array<i32>} : memref<1x32x1xf32, #tpu.memory_space<vmem>>, vector<1x32x1xf32>,
    return
  }
  func.func @transform_0(%arg0: i32, %arg1: i32, %arg2: i32) -> (i32, i32, i32) {
    %c1_i32 = arith.constant 1 : i32
    %0 = arith.muli %arg0, %c1_i32 : i32
    %1 = arith.addi %0, %arg1 : i32
    %c0_i32 = arith.constant 0 : i32
    %c0_i32_0 = arith.constant 0 : i32
    return %1, %c0_i32, %arg2 : i32, i32, i32
  }
  func.func @transform_1(%arg0: i32, %arg1: i32, %arg2: i32) -> (i32, i32, i32) {
    %c0_i32 = arith.constant 0 : i32
    %c0_i32_0 = arith.constant 0 : i32
    %c0_i32_1 = arith.constant 0 : i32
    return %arg0, %c0_i32, %c0_i32_0 : i32, i32, i32
  }
  func.func @transform_2(%arg0: i32, %arg1: i32, %arg2: i32) -> (i32, i32, i32) {
    %c0_i32 = arith.constant 0 : i32
    %c0_i32_0 = arith.constant 0 : i32
    %c0_i32_1 = arith.constant 0 : i32
    return %arg0, %c0_i32, %c0_i32_0 : i32, i32, i32
  }
}

</mosaic_0001>

<bundles_post_ra>
// kernel: tpu_custom_call.1
= control target key start
LH: loop header
LB: loop body
LE: loop exit
PB: predicated region body
PF: predicated region fallthrough
CT: control target
= control target key end

     0   :  { %8 = vsyncpa [#allocation3], 0  ;;  %s1012_s0 = inlined_call_operand.hbm [shape: bf16[2,32,256], index: 0, kind: input, shape index: {}]   ;;  %s1013_s1 = inlined_call_operand.hbm [shape: f32[2,32,32], index: 1, kind: output, shape index: {0}]   ;;  %s1014_s2 = inlined_call_operand.vmem [shape: f32[2,32,1], index: 2, kind: output, shape index: {1}]  }
   0x1   :  { %10 = vsyncpa [#allocation3 + $0x1], 0 }
   0x2   :  { %11 = vsyncpa [#allocation4], 0 }
   0x3   :  { %13 = vsyncpa [#allocation4 + $0x1], 0  ;;  %s778_s9 = smov 0   ;;  %s780_s10 = smov 0  }
   0x4   :  { %s782_s11 = smov 0   ;;  %s784_s12 = smov 0  }
   0x5   :  { %s786_s13 = smov 0   ;;  %s788_s14 = smov 0  }
   0x6   :  { %s790_s15 = smov 0   ;;  %s792_s16 = smov 0  }
   0x7   :  { %s794_s17 = smov 0   ;;  %s796_s18 = smov 0  }
   0x8   :  { %s798_s19 = smov 0  }
   0x9 LB: > { %s458_s20 = sadd.s32 4294967295, %s753_s19   ;;  %s459_s21 = sadd.s32 4294967294, %s753_s19   ;;  %s753_s19 = sphi %s798_s19, %s19_s19   ;;  %s749_s18 = sphi %s796_s18, %s1037_s18   ;;  %s745_s17 = sphi %s794_s17, %s1036_s17   ;;  %s741_s16 = sphi %s792_s16, %s1035_s16   ;;  %s737_s15 = sphi %s790_s15, %s1034_s15   ;;  %s733_s14 = sphi %s788_s14, %s1033_s14   ;;  %s729_s13 = sphi %s786_s13, %s1032_s13   ;;  %s725_s12 = sphi %s784_s12, %s1031_s12   ;;  %s721_s11 = sphi %s782_s11, %s1030_s11   ;;  %s717_s10 = sphi %s780_s10, %s1029_s10   ;;  %s713_s9 = sphi %s778_s9, %s1028_s9  }
   0xa   : > { %s31_s22 = sadd.s32 1, %s745_s17  ;;  %s38_s23 = sadd.s32 1, %s749_s18 }
   0xb   : > { %p32_p0 = scmp.ge.s32.totalorder %s31_s22, 2  ;;  %s49_s24 = sadd.s32 1, %s733_s14 }
   0xc   : > { %p56_p1 = scmp.ne.s32.totalorder %s733_s14, %s729_s13  ;;  %p57_p2 = scmp.eq.s32.totalorder %s753_s19, 0 }
   0xd   : > { %s1039_s22 = smov (%p32_p0, %s31_s22), 0  ;;  %s1041_s23 = smov (!%p32_p0, %s38_s23), %s749_s18 }
   0xe   : > { %1017 = sst [smem:[#allocation8_spill]] %s1039_s22  ;;  %s45_s25 = ssub.s32 %s745_s17, %s1039_s22 }
   0xf   : > { %p844_p3 = por %p57_p2, %p56_p1  ;;  %p40_p4 = scmp.ge.s32.totalorder %s1041_s23, 2 }
  0x10   : > { %p62_p5 = scmp.ne.s32.totalorder %s729_s13, %s725_s12  ;;  %p63_p6 = scmp.eq.s32.totalorder %s458_s20, 0 }
  0x11   : > { %s75_s27 = sadd.s32 1, %s721_s11  ;;  %s1043_s23 = smov (%p40_p4, %s1041_s23), 0 }
  0x12   : > { %1019 = sst [smem:[#allocation9_spill]] %s1043_s23  ;;  %p852_p7 = por %p63_p6, %p62_p5 }
  0x13   : > { %p85_p8 = scmp.ne.s32.totalorder %s721_s11, %s717_s10  ;;  %s44_s29 = ssub.s32 %s749_s18, %s1043_s23 }
  0x14   : > { %p86_p9 = scmp.eq.s32.totalorder %s458_s20, 3  ;;  %s46_s30 = sor.u32 %s45_s25, %s44_s29 }
  0x15   : > { %p73_p10 = scmp.eq.s32.totalorder %s44_s29, 0  ;;  %p47_p11 = scmp.eq.s32.totalorder %s46_s30, 0 }
  0x16   : > { %p860_p12 = por %p86_p9, %p85_p8  ;;  %p91_p13 = scmp.ne.s32.totalorder %s717_s10, %s713_s9 }
  0x17   : > { %s865_s4 = scalar_select %p73_p10, %s721_s11, %s75_s27  }
  0x18   : > { %s868_s5 = scalar_select %p47_p11, %s733_s14, %s49_s24  }
  0x19   : > { %p92_p0 = scmp.eq.s32.totalorder %s459_s21, 3  ;;  %p505_p1 = scmp.lt.s32.totalorder %s753_s19, 4 }
  0x1a   : > { %1022 = sst [smem:[#allocation10_spill]] %s868_s5  ;;  %s138_s7 = sand.u32 1, %s733_s14  }
  0x1b   : > { %p873_p2 = por %p92_p0, %p91_p13  ;;  %s462_s8 = sshll.u32 %s138_s7, 4 }
  0x1c   : > { %s463_s12 = sshll.u32 %s749_s18, 3  ;;  %s142_s25 = scalar_lea.vmem [#allocation2], %s462_s8 }
  0x1d   : > { %s148_s20 = sadd.s32 %s745_s17, %s463_s12  ;;  %s151_s29 = sshll.u32 %s142_s25, 4  ;;  %s152_s29 = int_to_ptr.vmem [resolvable:$true] %s151_s29 }
  0x1e   : > { %s464_s30 = sshll.u32 %s148_s20, 6  ;;  %p885_p4 = pnand %p505_p1, %p844_p3 }
  0x1f   : > { %s150_s24 = scalar_lea.hbm %s1012_s0, %s464_s30  ;;  %s139_s22 = scalar_lea.sflag [#allocation3], %s138_s7 }
  0x20   : > { %p607_p5 = pneg %p885_p4  ;;  %s618_s5 = scalar_lea.vmem %s152_s29, 256 }
  0x21   : > { %p619_p6 = scmp.ne.s32.totalorder %s152_s29, %s618_s5  ;;  %s755_s8 = smov [#allocation2]  }
  0x22   : > { %s623_s12 = sshll.u32 %s755_s8, 4  ;;  %s624_s12 = int_to_ptr.vmem [resolvable:$false] %s623_s12 }
  0x23   : > { %p621_p8 = pnand %p619_p6, %p607_p5  ;;  %s625_s20 = scalar_lea.vmem %s624_s12, 512 }
  0x24   : > { %p626_p10 = scmp.lt.s32.totalorder %s152_s29, %s624_s12  ;;  %p627_p11 = scmp.lt.s32.totalorder %s625_s20, %s618_s5 }
  0x25   : > { %p622_p9 = pneg %p621_p8 }
  0x26   : > { %p628_p13 = por %p627_p11, %p626_p10 }
  0x28   : > { %p629_p0 = pnand %p628_p13, %p622_p9 }
  0x2a   : > { %632 = shalt.err (!%p629_p0)
}
  0x2b   : > { %s756_s23 = smov 128   ;;  %s757_s26 = smov 64  }
  0x2c   : > { %s758_s7 = smov 4   ;;  %p465_p3 = scmp.ge.s32.totalorder %s753_s19, 1 }
  0x2d   : > { %500 = dma.hbm_to_vmem [thread:$0]  (!%p885_p4), %s150_s24, 256, %s152_s29, %s139_s22, %s756_s23, %s757_s26, %s758_s7  }
  0x2e   : > { %p159_p1 = scmp.lt.s32.totalorder %s753_s19, 5 }
  0x30   : > { %p160_p5 = pnand %p465_p3, %p159_p1 }
  0x31   : > { %s165_s25 = sand.u32 (!%p160_p5), 1, %s729_s13  }
  0x32   : > { %163 = sbr.rel (%p160_p5) target bundleno = 296 (0x128), region = 24  ;;  %s466_s30 = sshll.u32 (!%p160_p5), %s165_s25, 4 }
  0x33   : > { %s166_s5 = scalar_lea.sflag (!%p160_p5), [#allocation3], %s165_s25  ;;  %s169_s27 = scalar_lea.vmem (!%p160_p5), [#allocation2], %s466_s30 }
  0x37   : > { %704 = dma.done.wait (%p852_p7), %s166_s5, 256  }
  0x38   : > { %706 = vsyncadd (%p852_p7), %s166_s5, 4294967040  ;;  %s185_s22 = sand.u32 1, %s717_s10   ;;  %p196_p4 = scmp.lt.s32.totalorder %s741_s16, 1 }
  0x39   : > { %s467_s29 = sshll.u32 %s185_s22, 5  ;;  %p203_p6 = scmp.eq.s32.totalorder %s737_s15, 0 }
  0x3a   : > { %s197_s24 = scalar_select %p196_p4, %s741_s16, 1  ;;  %vm208_vm0 = vcmask (%p203_p6), 261120   ;;  %vm213_vm1 = vcmask (%p203_p6), 7168   ;;  %v759_v0 = vmov (%p203_p6), 0.0  }
  0x3b   : > { %s911_s23 = scalar_lea.vmem [#allocation5], %s467_s29  ;;  %207 = sbr.rel (!%p203_p6) target bundleno = 64 (0x40), region = 32 }
  0x3c   : > { %s478_s21 = sshll.u32 %s197_s24, 5  ;;  %209 = vst.msk [vmem:[%s911_s23] sm:$0xff] (%p203_p6), %vm208_vm0, %v759_v0  ;;  %210 = vst.msk [vmem:[%s911_s23 + $0x8] sm:$0xff] (%p203_p6), %vm208_vm0, %v759_v0 }
  0x3d   : > { %s909_s20 = scalar_lea.vmem %s1014_s2, %s478_s21  ;;  %211 = vst.msk [vmem:[%s911_s23 + $0x10] sm:$0xff] (%p203_p6), %vm208_vm0, %v759_v0  ;;  %212 = vst.msk [vmem:[%s911_s23 + $0x18] sm:$0xff] (%p203_p6), %vm208_vm0, %v759_v0 }
  0x3e   : > { %214 = vst.msk [vmem:[%s909_s20] sm:$0xff] (%p203_p6), %vm213_vm1, %v759_v0  ;;  %215 = vst.msk [vmem:[%s909_s20 + $0x8] sm:$0xff] (%p203_p6), %vm213_vm1, %v759_v0 }
  0x3f   : > { %216 = vst.msk [vmem:[%s909_s20 + $0x10] sm:$0xff] (%p203_p6), %vm213_vm1, %v759_v0  ;;  %217 = vst.msk [vmem:[%s909_s20 + $0x18] sm:$0xff] (%p203_p6), %vm213_vm1, %v759_v0 }
  0x40 PF: > { %v220_v1 = vld [vmem:[%s169_s27 + $0x8] sm:$0xff]   ;;  %v218_v2 = vld [vmem:[%s169_s27] sm:$0xff]   ;;  %vm316_vm2 = vcmask 7168   ;;  %vm291_vm3 = vcmask 261120   ;;  %s480_s15 = sshll.u32 %s741_s16, 9  ;;  %s340_s28 = sshll.u32 %s911_s23, 4  ;;  %s944_s28 = int_to_ptr.vmem [resolvable:$true] %s340_s28 }
  0x41   : > { %v302_v3 = vunpack.c.l.bf16 %v220_v1  ;;  %v300_v4 = vunpack.c.l.bf16 %v218_v2  ;;  %485 = vmatprep.subr.bf16.mxu0 %v220_v1  ;;  %489 = vmatprep.mubr.bf16.mxu0 %v218_v2  ;;  %v303_v5 = vunpack.c.h.bf16 %v220_v1  ;;  %v301_v6 = vunpack.c.h.bf16 %v218_v2  ;;  %s942_s25 = scalar_lea.hbm %s1013_s1, %s480_s15  ;;  %s952_s16 = scalar_lea.sflag [#allocation4], %s185_s22 }
  0x42   : > { %486 = vmatpush3.bf16.xpose.msra.mxu0 %v220_v1  ;;  %s633_s30 = scalar_lea.vmem %s944_s28, 512  ;;  %s760_s5 = smov [#allocation5]  }
  0x43   : > { %308 = vadd.xlane.f32.xlu1 %v302_v3  ;;  %487 = vmatprep.subr.bf16.mxu0 %v218_v2  ;;  %v283_v21 = vld [vmem:[%s911_s23] sm:$0xff]  ;;  %v284_v27 = vld [vmem:[%s911_s23 + $0x8] sm:$0xff]  ;;  %p634_p7 = scmp.ne.s32.totalorder %s944_s28, %s633_s30  ;;  %s637_s27 = sshll.u32 %s760_s5, 4  ;;  %s638_s27 = int_to_ptr.vmem [resolvable:$false] %s637_s27 }
  0x44   : > { %304 = vadd.xlane.f32.xlu0 %v300_v4  ;;  %v285_v19 = vld [vmem:[%s911_s23 + $0x10] sm:$0xff]  ;;  %v286_v24 = vld [vmem:[%s911_s23 + $0x18] sm:$0xff]  ;;  %s639_s29 = scalar_lea.vmem %s638_s27, 1024  ;;  %p640_p10 = scmp.lt.s32.totalorder %s944_s28, %s638_s27 }
  0x45   : > { %v296_v8 = vld [vmem:[%s909_s20] sm:$0xff]  ;;  %v297_v14 = vld [vmem:[%s909_s20 + $0x8] sm:$0xff]  ;;  %p635_p8 = pnand %p634_p7, %p860_p12  ;;  %p641_p11 = scmp.lt.s32.totalorder %s639_s29, %s633_s30 }
  0x46   : > { %v298_v7 = vld [vmem:[%s909_s20 + $0x10] sm:$0xff]  ;;  %v299_v13 = vld [vmem:[%s909_s20 + $0x18] sm:$0xff] }
  0x47   : > { %310 = vadd.xlane.f32.xlu1 %v303_v5  ;;  %p636_p9 = pneg %p635_p8  ;;  %p642_p13 = por %p641_p11, %p640_p10 }
  0x48   : > { %306 = vadd.xlane.f32.xlu0 %v301_v6 }
  0x49   : > { %p643_p0 = pnand %p642_p13, %p636_p9 }
  0x4a   : > { %488 = vmatpush3.bf16.xpose.msra.mxu0 %v218_v2 }
  0x51   : > { %490 = vmatmul.mubr.bf16.vlgmr.msra.gmra.mxu0 %v220_v1 }
  0xcc   : > { %v309_v9 = vpop.xlane.xlu1 %308 }
  0xcd   : > { %v314_v10 = vadd.f32 %v309_v9, %v298_v7  ;;  %v305_v11 = vpop.xlane.xlu0 %304 }
  0xce   : > { %v312_v12 = vadd.f32 %v305_v11, %v296_v8 }
  0xcf   : > { %319 = vst.msk [vmem:[%s909_s20 + $0x10] sm:$0xff] %vm316_vm2, %v314_v10 }
  0xd0   : > { %317 = vst.msk [vmem:[%s909_s20] sm:$0xff] %vm316_vm2, %v312_v12  ;;  %v311_v15 = vpop.xlane.xlu1 %310 }
  0xd1   : > { %v315_v16 = vadd.f32 %v311_v15, %v299_v13  ;;  %v307_v17 = vpop.xlane.xlu0 %306 }
  0xd2   : > { %v313_v18 = vadd.f32 %v307_v17, %v297_v14 }
  0xd3   : > { %320 = vst.msk [vmem:[%s909_s20 + $0x18] sm:$0xff] %vm316_vm2, %v315_v16 }
  0xd4   : > { %318 = vst.msk [vmem:[%s909_s20 + $0x8] sm:$0xff] %vm316_vm2, %v313_v18 }
 0x111   : > { %v491_v20 = vpop.f32.mrf.mxu0 }
 0x112   : > { %v289_v22 = vadd.f32 %v491_v20, %v285_v19 }
 0x113   : > { %v268_v23 = vpop.f32.mrf.mxu0 }
 0x114   : > { %294 = vst.msk [vmem:[%s911_s23 + $0x10] sm:$0xff] %vm291_vm3, %v289_v22  ;;  %v287_v25 = vadd.f32 %v283_v21, %v268_v23 }
 0x115   : > { %v492_v26 = vpop.f32.mrf.mxu0 }
 0x116   : > { %292 = vst.msk [vmem:[%s911_s23] sm:$0xff] %vm291_vm3, %v287_v25  ;;  %v290_v28 = vadd.f32 %v492_v26, %v286_v24 }
 0x117   : > { %v271_v29 = vpop.f32.mrf.mxu0 }
 0x118   : > { %295 = vst.msk [vmem:[%s911_s23 + $0x18] sm:$0xff] %vm291_vm3, %v290_v28  ;;  %v288_v30 = vadd.f32 %v284_v27, %v271_v29 }
 0x11a   : > { %293 = vst.msk [vmem:[%s911_s23 + $0x8] sm:$0xff] %vm291_vm3, %v288_v30 }
 0x11b   : > { %646 = shalt.err (!%p643_p0)
}
 0x11c   : > { %s647_s22 = scalar_lea.hbm %s942_s25, 512  ;;  %s651_s8 = scalar_lea.hbm %s1013_s1, 1024 }
 0x11d   : > { %p648_p3 = scmp.ne.s32.totalorder %s942_s25, %s647_s22  ;;  %p652_p4 = scmp.lt.s32.totalorder %s942_s25, %s1013_s1 }
 0x11e   : > { %p653_p6 = scmp.lt.s32.totalorder %s651_s8, %s647_s22 }
 0x11f   : > { %p649_p1 = pnand %p648_p3, %p860_p12 }
 0x120   : > { %p654_p7 = por %p653_p6, %p652_p4 }
 0x121   : > { %p650_p5 = pneg %p649_p1 }
 0x123   : > { %p655_p8 = pnand %p654_p7, %p650_p5 }
 0x125   : > { %658 = shalt.err (!%p655_p8)
}
 0x126   : > { %s761_s23 = smov 128   ;;  %s762_s15 = smov 8  }
 0x127   : > { %495 = dma.vmem_to_hbm [thread:$0]  (%p860_p12), %s944_s28, 512, %s942_s25, %s952_s16, %s761_s23, %s761_s23, %s762_s15  }
 0x128 PF: > { %p506_p9 = scmp.ge.s32.totalorder %s753_s19, 2  ;;  %s358_s26 = sand.u32 1, %s713_s9  }
 0x129   : > { %s359_s7 = scalar_lea.sflag [#allocation4], %s358_s26 }
 0x12a   : > { %p502_p10 = pnand %p506_p9, %p873_p2 }
 0x12c   : > { %p503_p11 = pneg %p502_p10 }
 0x12e   : > { %708 = dma.done.wait (%p503_p11), %s359_s7, 512  }
 0x12f   : > { %710 = vsyncadd (%p503_p11), %s359_s7, 4294966784  ;;  %s19_s19 = sadd.s32 1, %s753_s19   ;;  %s1025_s3 = sld [smem:[#allocation10_spill]] }
 0x130   : > { %p16_p13 = scmp.ge.s32.totalorder %s19_s19, 6   ;;  %s1026_s28 = sld [smem:[#allocation8_spill]] }
 0x131   : > { %s1027_s25 = sld [smem:[#allocation9_spill]]  ;;  %s1028_s9 = smov %s717_s10 }
 0x132   : > { %s1029_s10 = smov %s721_s11  ;;  %s1030_s11 = smov %s865_s4 }
 0x133   : > { %s1031_s12 = smov %s729_s13  ;;  %s1032_s13 = smov %s733_s14 }
 0x134   : > { %s1034_s15 = smov %s745_s17  ;;  %s1035_s16 = smov %s749_s18 }
 0x135   : > { %s1033_s14 = smov %s1025_s3  ;;  %18 = sbr.rel (!%p16_p13) target bundleno = 9 (0x9), region = 85 }
 0x136   : > { %s1036_s17 = smov %s1026_s28 }
 0x137   : > { %s1037_s18 = smov %s1027_s25 }
 0x13a   :  { %372 = vsyncpa [#allocation3], 1 }
 0x13b   :  { %374 = vsyncpa [#allocation3 + $0x1], 1 }
 0x13c   :  { %375 = vsyncpa [#allocation4], 1 }
 0x13d   :  { %377 = vsyncpa [#allocation4 + $0x1], 1 }

</bundles_post_ra>
